<compile_context>
chip_gen: v5e
topology: v5e:2x2
jax: 0.10.0
libtpu: 0.0.40
codegen_flags: <defaults>
</compile_context>

<pallas_src>
import jax
import jax.numpy as jnp
from jax.experimental import pallas as pl
from jax.experimental.pallas import tpu as pltpu


def _make_ce_kernel(n_total: int):
    inv_n = 1.0 / float(n_total)

    def kernel(x_ref, t_ref, o_ref, acc_ref):
        i = pl.program_id(0)

        @pl.when(i == 0)
        def _():
            acc_ref[...] = jnp.zeros_like(acc_ref)

        x = x_ref[...]                                      # (TN, C) f32
        t = t_ref[...]                                      # (TN, 1) i32

        # numerically stable log-sum-exp per row
        m = jnp.max(x, axis=-1, keepdims=True)              # (TN, 1)
        lse = m + jnp.log(jnp.sum(jnp.exp(x - m), axis=-1, keepdims=True))

        # pick x[r, t[r]] via a one-hot mask (2-D iota is TPU-legal)
        col = jax.lax.broadcasted_iota(jnp.int32, x.shape, 1)   # (TN, C)
        picked = jnp.sum(jnp.where(col == t, x, 0.0),
                         axis=-1, keepdims=True)                # (TN, 1)

        # accumulate the per-row losses of this tile
        acc_ref[...] += jnp.sum(lse - picked, keepdims=True)    # (1, 1)

        @pl.when(i == pl.num_programs(0) - 1)
        def _():
            o_ref[...] = acc_ref[...] * inv_n                   # mean reduction

    return kernel


def cross_loss_forward(x, target, *, block_rows=None):
    """F.cross_entropy(x, target) with reduction='mean'.

    x:      (N, C) float32 logits
    target: (N,)   integer class indices
    returns scalar float32 loss
    """
    n, c = x.shape
    if block_rows is None:
        # single tile for small batches; otherwise tile the batch axis
        block_rows = n if n <= 512 else 512
    assert n % block_rows == 0, "batch must be divisible by the row tile"
    grid = (n // block_rows,)

    t2 = target.astype(jnp.int32).reshape(n, 1)

    out = pl.pallas_call(
        _make_ce_kernel(n),
        out_shape=jax.ShapeDtypeStruct((1, 1), jnp.float32),
        grid_spec=pltpu.PrefetchScalarGridSpec(
            num_scalar_prefetch=0,
            grid=grid,
            in_specs=[
                pl.BlockSpec((block_rows, c), lambda i: (i, 0)),
                pl.BlockSpec((block_rows, 1), lambda i: (i, 0)),
            ],
            out_specs=pl.BlockSpec((1, 1), lambda i: (0, 0)),
            scratch_shapes=[pltpu.VMEM((1, 1), jnp.float32)],
        ),
        compiler_params=pltpu.CompilerParams(
            dimension_semantics=("arbitrary",)),
    )(x, t2)
    return out[0, 0]


def _reference(x, target):
    lse = jax.scipy.special.logsumexp(x, axis=-1)
    picked = jnp.take_along_axis(
        x, target.astype(jnp.int32)[:, None], axis=-1)[:, 0]
    return jnp.mean(lse - picked)


if __name__ == "__main__":
    key = jax.random.PRNGKey(0)
    kx, kt = jax.random.split(key)

    N, C = 8, 32                        # small shapes: batch=8, classes=32
    x = jax.random.normal(kx, (N, C), jnp.float32)
    target = jax.random.randint(kt, (N,), 0, C, dtype=jnp.int32)

    loss = jax.block_until_ready(cross_loss_forward(x, target))
    ref = jax.block_until_ready(_reference(x, target))

    assert loss.shape == (), loss.shape
    assert jnp.allclose(loss, ref, rtol=1e-5, atol=1e-5), (loss, ref)
    print("KERNEL_OK")
</pallas_src>

<mosaic_0001>
module attributes {stable_mosaic.version = 11 : i64} {
  func.func @kernel(%arg0: i32, %arg1: memref<8x32xf32, #tpu.memory_space<vmem>>, %arg2: memref<8x1xi32, #tpu.memory_space<vmem>>, %arg3: memref<1x1xf32, #tpu.memory_space<vmem>>, %arg4: memref<1x1xf32, #tpu.memory_space<vmem>>) attributes {dimension_semantics = [#tpu.dimension_semantics<arbitrary>], iteration_bounds = array<i64: 1>, scalar_prefetch = 0 : i64, scratch_operands = 1 : i64, tpu.core_type = #tpu.core_type<tc>, window_params = [{transform_indices = @transform_0, window_bounds = array<i64: 8, 32>}, {transform_indices = @transform_1, window_bounds = array<i64: 8, 1>}, {pipeline_mode = #tpu.pipeline_mode<synchronous>, transform_indices = @transform_2, window_bounds = array<i64: 1, 1>}]} {
    %c0_i32 = arith.constant 0 : i32
    %0 = arith.cmpi eq, %arg0, %c0_i32 : i32
    %1 = arith.extui %0 : i1 to i32
    %c0_i32_0 = arith.constant 0 : i32
    %2 = arith.cmpi ne, %1, %c0_i32_0 : i32
    scf.if %2 {
      %cst_14 = arith.constant 0.000000e+00 : f32
      %33 = vector.broadcast %cst_14 : f32 to vector<1x1xf32>
      %c0_15 = arith.constant 0 : index
      %c0_16 = arith.constant 0 : index
      %34 = vector.load %arg4[%c0_15, %c0_16] : memref<1x1xf32, #tpu.memory_space<vmem>>, vector<1x1xf32>
      tpu.vector_store %arg4[%c0_15, %c0_16], %33 {strides = array<i32>} : memref<1x1xf32, #tpu.memory_space<vmem>>, vector<1x1xf32>,
    } else {
    }
    %c0 = arith.constant 0 : index
    %c0_1 = arith.constant 0 : index
    %3 = vector.load %arg1[%c0, %c0_1] : memref<8x32xf32, #tpu.memory_space<vmem>>, vector<8x32xf32>
    %c0_2 = arith.constant 0 : index
    %c0_3 = arith.constant 0 : index
    %4 = vector.load %arg2[%c0_2, %c0_3] : memref<8x1xi32, #tpu.memory_space<vmem>>, vector<8x1xi32>
    %cst = arith.constant dense<0xFF800000> : vector<8xf32>
    %5 = vector.multi_reduction <maximumf>, %3, %cst [1] : vector<8x32xf32> to vector<8xf32>
    %6 = vector.shape_cast %5 : vector<8xf32> to vector<8x1xf32>
    %7 = vector.broadcast %6 : vector<8x1xf32> to vector<8x32xf32>
    %8 = arith.subf %3, %7 : vector<8x32xf32>
    %9 = math.exp %8 : vector<8x32xf32>
    %cst_4 = arith.constant dense<0.000000e+00> : vector<8xf32>
    %10 = vector.multi_reduction <add>, %9, %cst_4 [1] : vector<8x32xf32> to vector<8xf32>
    %11 = vector.shape_cast %10 : vector<8xf32> to vector<8x1xf32>
    %12 = math.log %11 : vector<8x1xf32>
    %13 = arith.addf %6, %12 : vector<8x1xf32>
    %14 = tpu.iota {dimensions = array<i32: 1>} : vector<8x32xi32>
    %15 = vector.broadcast %4 : vector<8x1xi32> to vector<8x32xi32>
    %16 = arith.cmpi eq, %14, %15 : vector<8x32xi32>
    %cst_5 = arith.constant 0.000000e+00 : f32
    %17 = vector.broadcast %cst_5 : f32 to vector<8x32xf32>
    %18 = arith.select %16, %3, %17 : vector<8x32xi1>, vector<8x32xf32>
    %cst_6 = arith.constant dense<0.000000e+00> : vector<8xf32>
    %19 = vector.multi_reduction <add>, %18, %cst_6 [1] : vector<8x32xf32> to vector<8xf32>
    %20 = vector.shape_cast %19 : vector<8xf32> to vector<8x1xf32>
    %c0_7 = arith.constant 0 : index
    %c0_8 = arith.constant 0 : index
    %21 = vector.load %arg4[%c0_7, %c0_8] : memref<1x1xf32, #tpu.memory_space<vmem>>, vector<1x1xf32>
    %22 = arith.subf %13, %20 : vector<8x1xf32>
    %23 = vector.shape_cast %22 : vector<8x1xf32> to vector<1x8x1xf32>
    %cst_9 = arith.constant dense<0.000000e+00> : vector<1xf32>
    %24 = vector.multi_reduction <add>, %23, %cst_9 [1, 2] : vector<1x8x1xf32> to vector<1xf32>
    %25 = vector.shape_cast %24 : vector<1xf32> to vector<1x1x1xf32>
    %26 = vector.extract %25[0, 0, 0] : f32 from vector<1x1x1xf32>
    %27 = vector.broadcast %26 : f32 to vector<1x1xf32>
    %28 = arith.addf %21, %27 : vector<1x1xf32>
    %c0_10 = arith.constant 0 : index
    %c0_11 = arith.constant 0 : index
    %29 = vector.load %arg4[%c0_10, %c0_11] : memref<1x1xf32, #tpu.memory_space<vmem>>, vector<1x1xf32>
    tpu.vector_store %arg4[%c0_10, %c0_11], %28 {strides = array<i32>} : memref<1x1xf32, #tpu.memory_space<vmem>>, vector<1x1xf32>,
    %c0_i32_12 = arith.constant 0 : i32
    %30 = arith.cmpi eq, %arg0, %c0_i32_12 : i32
    %31 = arith.extui %30 : i1 to i32
    %c0_i32_13 = arith.constant 0 : i32
    %32 = arith.cmpi ne, %31, %c0_i32_13 : i32
    scf.if %32 {
      %c0_14 = arith.constant 0 : index
      %c0_15 = arith.constant 0 : index
      %33 = vector.load %arg4[%c0_14, %c0_15] : memref<1x1xf32, #tpu.memory_space<vmem>>, vector<1x1xf32>
      %cst_16 = arith.constant 1.250000e-01 : f32
      %34 = vector.broadcast %cst_16 : f32 to vector<1x1xf32>
      %35 = arith.mulf %33, %34 : vector<1x1xf32>
      %c0_17 = arith.constant 0 : index
      %c0_18 = arith.constant 0 : index
      %36 = vector.load %arg3[%c0_17, %c0_18] : memref<1x1xf32, #tpu.memory_space<vmem>>, vector<1x1xf32>
      tpu.vector_store %arg3[%c0_17, %c0_18], %35 {strides = array<i32>} : memref<1x1xf32, #tpu.memory_space<vmem>>, vector<1x1xf32>,
    } else {
    }
    return
  }
  func.func @transform_0(%arg0: i32) -> (i32, i32) {
    %c0_i32 = arith.constant 0 : i32
    %c0_i32_0 = arith.constant 0 : i32
    return %arg0, %c0_i32 : i32, i32
  }
  func.func @transform_1(%arg0: i32) -> (i32, i32) {
    %c0_i32 = arith.constant 0 : i32
    %c0_i32_0 = arith.constant 0 : i32
    return %arg0, %c0_i32 : i32, i32
  }
  func.func @transform_2(%arg0: i32) -> (i32, i32) {
    %c0_i32 = arith.constant 0 : i32
    %c0_i32_0 = arith.constant 0 : i32
    %c0_i32_1 = arith.constant 0 : i32
    return %c0_i32, %c0_i32_0 : i32, i32
  }
}

</mosaic_0001>

<bundles_post_ra>
// kernel: tpu_custom_call.1
= control target key start
LH: loop header
LB: loop body
LE: loop exit
PB: predicated region body
PF: predicated region fallthrough
CT: control target
= control target key end

     0   :  { %vm20_vm0 = vcmask 261120   ;;  %s151_s0 = inlined_call_operand.vmem [shape: f32[8,32], index: 0, kind: input, shape index: {}]   ;;  %s152_s1 = inlined_call_operand.vmem [shape: s32[8,1], index: 1, kind: input, shape index: {}]   ;;  %s153_s2 = inlined_call_operand.hbm [shape: f32[1,1], index: 2, kind: output, shape index: {}]  }
   0x1   :  { %v18_v0 = vld [vmem:[%s151_s0] sm:$0xff] }
   0x2   :  { %7 = vsyncpa [#allocation4], 0  ;;  %v21_v1 = vsel %vm20_vm0, %v18_v0, -inf  ;;  %v118_v2 = vmov 0   ;;  %v19_v3 = vld [vmem:[%s152_s1] sm:$0xff]  ;;  %v33_v9 = vlaneseq  ;;  %vm45_vm2 = vcmask 7168  }
   0x3   :  { %87 = vset.pattern.permute.xlu0 %v118_v2  ;;  %vm16_vm3 = vcmask 0   ;;  %v119_v21 = vmov 0.0   ;;  %s120_s1 = smov [#allocation3]   ;;  %s73_s16 = sshll.u32 %s153_s2, 4  ;;  %s74_s16 = int_to_ptr.hbm [resolvable:$true] %s73_s16 }
   0x4   :  { %22 = vmax.xlane.f32.xlu0 %v21_v1  ;;  %v34_v10 = vand.u32 127, %v33_v9  ;;  %17 = vst.msk [vmem:[#allocation2] sm:$0x1] %vm16_vm3, %v119_v21  ;;  %s71_s13 = sshll.u32 %s120_s1, 4  ;;  %s72_s13 = int_to_ptr.vmem [resolvable:$true] %s71_s13 }
   0xb   :  { %v43_v29 = vld [vmem:[#allocation2] sm:$0x1] }
  0x18   :  { %36 = vperm.xlu0 %87, %v19_v3  }
  0x77   :  { %v23_v4 = vpop.xlane.xlu0 %22 }
  0x78   :  { %v24_v5 = vsub.f32 %v18_v0, %v23_v4 }
  0x7a   :  { %v25_v6 = vmul.f32 1.442695, %v24_v5 }
  0x7c   :  { %88 = vpow2.f32 %v25_v6 }
  0x82   :  { %v89_v7 = vpop.eup %88 }
  0x83   :  { %v27_v8 = vsel %vm20_vm0, %v89_v7, 0.0 }
  0x84   :  { %28 = vadd.xlane.f32.xlu1 %v27_v8 }
  0x8a   :  { %v37_v11 = vpop.permute.xlu0 %36 }
  0x8b   :  { %vm38_vm1 = vcmp.eq.s32.totalorder %v34_v10, %v37_v11 }
  0x8c   :  { %v39_v12 = vsel %vm38_vm1, %v18_v0, 0.0 }
  0x8d   :  { %v40_v13 = vsel %vm20_vm0, %v39_v12, 0.0 }
  0x8e   :  { %41 = vadd.xlane.f32.xlu1 %v40_v13 }
  0xf7   :  { %v29_v14 = vpop.xlane.xlu1 %28 }
  0xf8   :  { %90 = vlog2.f32 %v29_v14 }
  0xfe   :  { %v91_v15 = vpop.eup %90 }
  0xff   :  { %v31_v16 = vmul.f32 0.6931472, %v91_v15 }
 0x101   :  { %v32_v17 = vadd.f32 %v31_v16, %v23_v4  ;;  %v42_v18 = vpop.xlane.xlu1 %41 }
 0x103   :  { %v44_v19 = vsub.f32 %v32_v17, %v42_v18 }
 0x105   :  { %v46_v20 = vsel %vm45_vm2, %v44_v19, 0.0 }
 0x106   :  { %47 = vadd.xlane.f32.xlu2 %v46_v20 }
 0x179   :  { %v48_v22 = vpop.xlane.xlu2 %47 }
 0x17a   :  { %v49_v23 = vrot.slane %v48_v22, 4 }
 0x17c   :  { %v50_v24 = vadd.f32 %v49_v23, %v48_v22 }
 0x17e   :  { %v51_v25 = vrot.slane %v50_v24, 2 }
 0x180   :  { %v52_v26 = vadd.f32 %v51_v25, %v50_v24 }
 0x182   :  { %v53_v27 = vrot.slane %v52_v26, 1 }
 0x184   :  { %v54_v28 = vadd.f32 %v53_v27, %v52_v26 }
 0x186   :  { %82 = vpush %v54_v28 }
 0x1b7   :  { %s83_s0 = spop %82 }
 0x1b8   :  { %v56_v30 = vstv %s83_s0 }
 0x1b9   :  { %v57_v31 = vadd.f32 %v56_v30, %v43_v29 }
 0x1bb   :  { %59 = vst.msk [vmem:[#allocation2] sm:$0x1] %vm16_vm3, %v57_v31 }
 0x1c2   :  { %v63_v32 = vld [vmem:[#allocation2] sm:$0x1] }
 0x1c3   :  { %v64_v33 = vmul.f32 0.125, %v63_v32 }
 0x1c5   :  { %65 = vst.msk [vmem:[#allocation3] sm:$0x1] %vm16_vm3, %v64_v33 }
 0x1c6   :  { %76 = dma.vmem_to_hbm [thread:$0]  %s72_s13, 16, %s74_s16, [#allocation4]  }
 0x1c7   :  { %116 = dma.done.wait [#allocation4], 16  }
 0x1c8   :  { %117 = vsyncadd [#allocation4], 4294967280 }
 0x1c9   :  { %81 = vsyncpa [#allocation4], 1 }

</bundles_post_ra>
